<compile_context>
chip_gen: v7x
topology: tpu7x:2x2x1
jax: 0.10.0
libtpu: 0.0.40
codegen_flags: <defaults>
</compile_context>

<pallas_src>
import functools

import jax
import jax.numpy as jnp
from jax.experimental import pallas as pl
from jax.experimental.pallas import tpu as pltpu


def _softplus(x):
    # Single-path numerically stable softplus: max(x,0) + log1p(exp(-|x|)).
    # Evaluates one exp and one log1p per element (vs. two each for the
    # two-branch jnp.where form).
    return jnp.maximum(x, 0.0) + jnp.log1p(jnp.exp(-jnp.abs(x)))


def beta_actor_kernel(x_ref, w1_ref, b1_ref, w2_ref, b2_ref,
                      wh_ref, bh_ref, out_ref):
    x = x_ref[...]

    # l1 + tanh
    h1 = jnp.dot(x, w1_ref[...], preferred_element_type=jnp.float32)
    h1 = jnp.tanh(h1 + b1_ref[...])

    # l2 + tanh
    h2 = jnp.dot(h1, w2_ref[...], preferred_element_type=jnp.float32)
    h2 = jnp.tanh(h2 + b2_ref[...])

    # fused alpha|beta head: one matmul over [hidden, 2*act], one softplus,
    # one lane-dense store of the [B, 2*act] slab.
    logits = jnp.dot(h2, wh_ref[...], preferred_element_type=jnp.float32)
    out_ref[...] = _softplus(logits + bh_ref[...]) + 1.0


@functools.partial(jax.jit, static_argnames=())
def beta_actor_forward(x, params):
    """x: [B, obs]  -> (alpha [B, act], beta [B, act])"""
    w1, b1, w2, b2, wa, ba, wb, bb = params
    B = x.shape[0]
    act = wa.shape[1]

    # Fuse the two heads into a single [hidden, 2*act] weight / [1, 2*act]
    # bias (done once under jit; constant-folded across calls).
    wh = jnp.concatenate([wa, wb], axis=1)
    bh = jnp.concatenate([ba, bb], axis=1)

    full = lambda a: pl.BlockSpec(a.shape, lambda: tuple(0 for _ in a.shape),
                                  memory_space=pltpu.VMEM)

    out_shape = jax.ShapeDtypeStruct((B, 2 * act), jnp.float32)

    out = pl.pallas_call(
        beta_actor_kernel,
        out_shape=out_shape,
        in_specs=[full(x), full(w1), full(b1), full(w2), full(b2),
                  full(wh), full(bh)],
        out_specs=pl.BlockSpec((B, 2 * act), lambda: (0, 0),
                               memory_space=pltpu.VMEM),
    )(x, w1, b1, w2, b2, wh, bh)

    alpha = out[:, :act]
    beta = out[:, act:]
    return alpha, beta


def init_params(key, obs_shape, action_shape, hidden_num=128):
    """Deterministic init mimicking nn.Linear's uniform(-1/sqrt(fan_in), ...)."""
    ks = jax.random.split(key, 8)

    def linear(kw, kb, fan_in, fan_out):
        bound = 1.0 / jnp.sqrt(jnp.float32(fan_in))
        # stored as [in, out] (transposed vs PyTorch's [out, in])
        w = jax.random.uniform(kw, (fan_in, fan_out), jnp.float32, -bound, bound)
        b = jax.random.uniform(kb, (1, fan_out), jnp.float32, -bound, bound)
        return w, b

    w1, b1 = linear(ks[0], ks[1], obs_shape, hidden_num)
    w2, b2 = linear(ks[2], ks[3], hidden_num, hidden_num)
    wa, ba = linear(ks[4], ks[5], hidden_num, action_shape)
    wb, bb = linear(ks[6], ks[7], hidden_num, action_shape)
    return (w1, b1, w2, b2, wa, ba, wb, bb)


def reference_forward(x, params):
    w1, b1, w2, b2, wa, ba, wb, bb = params
    h1 = jnp.tanh(x @ w1 + b1)
    h2 = jnp.tanh(h1 @ w2 + b2)
    alpha = jax.nn.softplus(h2 @ wa + ba) + 1.0
    beta = jax.nn.softplus(h2 @ wb + bb) + 1.0
    return alpha, beta


if __name__ == "__main__":
    key = jax.random.PRNGKey(0)
    k_param, k_x = jax.random.split(key)

    batch = 8
    obs_shape = 32
    action_shape = 8
    hidden_num = 128

    params = init_params(k_param, obs_shape, action_shape, hidden_num)
    x = jax.random.normal(k_x, (batch, obs_shape), dtype=jnp.float32)

    alpha, beta = beta_actor_forward(x, params)
    jax.block_until_ready((alpha, beta))

    ref_alpha, ref_beta = reference_forward(x, params)
    assert alpha.shape == (batch, action_shape)
    assert beta.shape == (batch, action_shape)
    assert jnp.allclose(alpha, ref_alpha, atol=1e-5, rtol=1e-5)
    assert jnp.allclose(beta, ref_beta, atol=1e-5, rtol=1e-5)
    # alpha, beta are softplus(.) + 1 >= 1 by construction (strict > 1 is
    # fragile under softplus underflow, so check >= 1).
    assert bool(jnp.all(alpha >= 1.0)) and bool(jnp.all(beta >= 1.0))

    print("KERNEL_OK")
</pallas_src>

<mosaic_0001>
module attributes {stable_mosaic.version = 11 : i64} {
  func.func @beta_actor_kernel(%arg0: memref<8x32xf32, #tpu.memory_space<vmem>>, %arg1: memref<32x128xf32, #tpu.memory_space<vmem>>, %arg2: memref<1x128xf32, #tpu.memory_space<vmem>>, %arg3: memref<128x128xf32, #tpu.memory_space<vmem>>, %arg4: memref<1x128xf32, #tpu.memory_space<vmem>>, %arg5: memref<128x16xf32, #tpu.memory_space<vmem>>, %arg6: memref<1x16xf32, #tpu.memory_space<vmem>>, %arg7: memref<8x16xf32, #tpu.memory_space<vmem>>) attributes {dimension_semantics = [], scalar_prefetch = 0 : i64, scratch_operands = 0 : i64, tpu.core_type = #tpu.core_type<tc>} {
    %c0 = arith.constant 0 : index
    %c0_0 = arith.constant 0 : index
    %0 = vector.load %arg0[%c0, %c0_0] : memref<8x32xf32, #tpu.memory_space<vmem>>, vector<8x32xf32>
    %c0_1 = arith.constant 0 : index
    %c0_2 = arith.constant 0 : index
    %1 = vector.load %arg1[%c0_1, %c0_2] : memref<32x128xf32, #tpu.memory_space<vmem>>, vector<32x128xf32>
    %cst = arith.constant dense<0.000000e+00> : vector<8x128xf32>
    %2 = tpu.matmul %0, %1, %cst {dimension_numbers = #tpu.dot_dimension_numbers<[1], [0], [0], [1], [0, 0, 1, 1], [], []>} : vector<8x32xf32>, vector<32x128xf32>, vector<8x128xf32> -> vector<8x128xf32>
    %c0_3 = arith.constant 0 : index
    %c0_4 = arith.constant 0 : index
    %3 = vector.load %arg2[%c0_3, %c0_4] : memref<1x128xf32, #tpu.memory_space<vmem>>, vector<1x128xf32>
    %4 = vector.broadcast %3 : vector<1x128xf32> to vector<8x128xf32>
    %5 = arith.addf %2, %4 : vector<8x128xf32>
    %6 = math.tanh %5 : vector<8x128xf32>
    %c0_5 = arith.constant 0 : index
    %c0_6 = arith.constant 0 : index
    %7 = vector.load %arg3[%c0_5, %c0_6] : memref<128x128xf32, #tpu.memory_space<vmem>>, vector<128x128xf32>
    %cst_7 = arith.constant dense<0.000000e+00> : vector<8x128xf32>
    %8 = tpu.matmul %6, %7, %cst_7 {dimension_numbers = #tpu.dot_dimension_numbers<[1], [0], [0], [1], [0, 0, 1, 1], [], []>} : vector<8x128xf32>, vector<128x128xf32>, vector<8x128xf32> -> vector<8x128xf32>
    %c0_8 = arith.constant 0 : index
    %c0_9 = arith.constant 0 : index
    %9 = vector.load %arg4[%c0_8, %c0_9] : memref<1x128xf32, #tpu.memory_space<vmem>>, vector<1x128xf32>
    %10 = vector.broadcast %9 : vector<1x128xf32> to vector<8x128xf32>
    %11 = arith.addf %8, %10 : vector<8x128xf32>
    %12 = math.tanh %11 : vector<8x128xf32>
    %c0_10 = arith.constant 0 : index
    %c0_11 = arith.constant 0 : index
    %13 = vector.load %arg5[%c0_10, %c0_11] : memref<128x16xf32, #tpu.memory_space<vmem>>, vector<128x16xf32>
    %cst_12 = arith.constant dense<0.000000e+00> : vector<8x16xf32>
    %14 = tpu.matmul %12, %13, %cst_12 {dimension_numbers = #tpu.dot_dimension_numbers<[1], [0], [0], [1], [0, 0, 1, 1], [], []>} : vector<8x128xf32>, vector<128x16xf32>, vector<8x16xf32> -> vector<8x16xf32>
    %c0_13 = arith.constant 0 : index
    %c0_14 = arith.constant 0 : index
    %15 = vector.load %arg6[%c0_13, %c0_14] : memref<1x16xf32, #tpu.memory_space<vmem>>, vector<1x16xf32>
    %16 = vector.broadcast %15 : vector<1x16xf32> to vector<8x16xf32>
    %17 = arith.addf %14, %16 : vector<8x16xf32>
    %cst_15 = arith.constant 0.000000e+00 : f32
    %18 = vector.broadcast %cst_15 : f32 to vector<8x16xf32>
    %19 = arith.maximumf %17, %18 : vector<8x16xf32>
    %20 = math.absf %17 : vector<8x16xf32>
    %cst_16 = arith.constant 0.000000e+00 : f32
    %21 = vector.broadcast %cst_16 : f32 to vector<8x16xf32>
    %22 = arith.subf %21, %20 : vector<8x16xf32>
    %23 = math.exp %22 : vector<8x16xf32>
    %24 = math.log1p %23 : vector<8x16xf32>
    %25 = arith.addf %19, %24 : vector<8x16xf32>
    %cst_17 = arith.constant 1.000000e+00 : f32
    %26 = vector.broadcast %cst_17 : f32 to vector<8x16xf32>
    %27 = arith.addf %25, %26 : vector<8x16xf32>
    %c0_18 = arith.constant 0 : index
    %c0_19 = arith.constant 0 : index
    %28 = vector.load %arg7[%c0_18, %c0_19] : memref<8x16xf32, #tpu.memory_space<vmem>>, vector<8x16xf32>
    tpu.vector_store %arg7[%c0_18, %c0_19], %27 {strides = array<i32>} : memref<8x16xf32, #tpu.memory_space<vmem>>, vector<8x16xf32>,
    return
  }
}

</mosaic_0001>

<bundles_post_ra>
// kernel: beta_actor_forward.1
= control target key start
LH: loop header
LB: loop body
LE: loop exit
PB: predicated region body
PF: predicated region fallthrough
CT: control target
= control target key end

     0   :  { %v511_v0 = vmov 0.0|0.0   ;;  %vm512_vm0 = vmmov 0   ;;  %v513_v4 = vmov 0.0   ;;  %vm38_vm1 = vcmask 261120   ;;  %s698_s1 = inlined_call_operand.vmem [shape: f32[32,128], index: 1, kind: input, shape index: {}]   ;;  %s699_s3 = inlined_call_operand.vmem [shape: f32[128,128], index: 3, kind: input, shape index: {}]   ;;  %s700_s0 = inlined_call_operand.vmem [shape: f32[8,32], index: 0, kind: input, shape index: {}]   ;;  %s701_s5 = inlined_call_operand.vmem [shape: f32[128,16], index: 5, kind: input, shape index: {}]   ;;  %s702_s2 = inlined_call_operand.vmem [shape: f32[1,128], index: 2, kind: input, shape index: {}]   ;;  %s703_s4 = inlined_call_operand.vmem [shape: f32[1,128], index: 4, kind: input, shape index: {}]   ;;  %s704_s6 = inlined_call_operand.vmem [shape: f32[1,16], index: 6, kind: input, shape index: {}]   ;;  %s705_s7 = inlined_call_operand.vmem [shape: f32[8,16], index: 7, kind: output, shape index: {}]  }
   0x1   :  { %446 = vmatprep.subr.bf16.mxu0 %v511_v0  ;;  %v27_v1 = vld [vmem:[%s698_s1] sm:$0xff]  ;;  %v28_v2 = vld [vmem:[%s698_s1 + $0x8] sm:$0xff]  ;;  %v29_v3 = vld [vmem:[%s698_s1 + $0x10] sm:$0xff]  ;;  %373 = vmatprep.mubr.msk.f32.mxu0 %vm512_vm0, %v513_v4  ;;  %vm316_vm3 = vcmask 130048  }
   0x2   :  { %v447_v5 = vpack.c.bf16 %v28_v2, %v27_v1  ;;  %v30_v6 = vld [vmem:[%s698_s1 + $0x18] sm:$0xff]  ;;  %452 = vmatprep.subr.bf16.mxu1 %v511_v0  ;;  %v113_v7 = vld [vmem:[%s699_s3] sm:$0xff]  ;;  %408 = vmatprep.mubr.msk.f32.mxu1 %vm512_vm0, %v513_v4  ;;  %v114_v8 = vld [vmem:[%s699_s3 + $0x8] sm:$0xff] }
   0x3   :  { %v115_v9 = vld [vmem:[%s699_s3 + $0x10] sm:$0xff]  ;;  %v116_v10 = vld [vmem:[%s699_s3 + $0x18] sm:$0xff]  ;;  %v450_v11 = vpack.c.bf16 %v30_v6, %v29_v3  ;;  %v453_v12 = vpack.c.bf16 %v114_v8, %v113_v7  ;;  %v117_v14 = vld [vmem:[%s699_s3 + $0x20] sm:$0xff] }
   0x4   :  { %448 = vmatpush3.bf16.msra.mxu0 %v447_v5  ;;  %v456_v13 = vpack.c.bf16 %v116_v10, %v115_v9  ;;  %v118_v15 = vld [vmem:[%s699_s3 + $0x28] sm:$0xff]  ;;  %v26_v16 = vld [vmem:[%s700_s0] sm:$0xff]  ;;  %v119_v18 = vld [vmem:[%s699_s3 + $0x30] sm:$0xff] }
   0x5   :  { %449 = vmatprep.subr.bf16.mxu0 %v511_v0  ;;  %454 = vmatpush3.bf16.msra.mxu1 %v453_v12  ;;  %v459_v17 = vpack.c.bf16 %v118_v15, %v117_v14  ;;  %v120_v19 = vld [vmem:[%s699_s3 + $0x38] sm:$0xff]  ;;  %v121_v21 = vld [vmem:[%s699_s3 + $0x40] sm:$0xff]  ;;  %v122_v22 = vld [vmem:[%s699_s3 + $0x48] sm:$0xff] }
   0x6   :  { %455 = vmatprep.subr.bf16.mxu1 %v511_v0  ;;  %v462_v20 = vpack.c.bf16 %v120_v19, %v119_v18  ;;  %v465_v23 = vpack.c.bf16 %v122_v22, %v121_v21  ;;  %v123_v24 = vld [vmem:[%s699_s3 + $0x50] sm:$0xff]  ;;  %v124_v25 = vld [vmem:[%s699_s3 + $0x58] sm:$0xff]  ;;  %v125_v27 = vld [vmem:[%s699_s3 + $0x60] sm:$0xff] }
   0x7   :  { %v468_v26 = vpack.c.bf16 %v124_v25, %v123_v24  ;;  %v126_v28 = vld [vmem:[%s699_s3 + $0x68] sm:$0xff]  ;;  %v127_v30 = vld [vmem:[%s699_s3 + $0x70] sm:$0xff]  ;;  %v128_v31 = vld [vmem:[%s699_s3 + $0x78] sm:$0xff] }
   0x8   :  { %451 = vmatpush3.bf16.msra.mxu0 %v450_v11  ;;  %v471_v29 = vpack.c.bf16 %v126_v28, %v125_v27  ;;  %v474_v32 = vpack.c.bf16 %v128_v31, %v127_v30  ;;  %v207_v33 = vld [vmem:[%s701_s5] sm:$0xff]  ;;  %v208_v34 = vld [vmem:[%s701_s5 + $0x8] sm:$0xff]  ;;  %v209_v35 = vld [vmem:[%s701_s5 + $0x10] sm:$0xff] }
   0x9   :  { %476 = vmatprep.subr.bf16.mxu0 %v511_v0  ;;  %457 = vmatpush3.bf16.msra.mxu1 %v456_v13  ;;  %v477_v36 = vpack.c.bf16 %v208_v34, %v207_v33  ;;  %v210_v37 = vld [vmem:[%s701_s5 + $0x18] sm:$0xff]  ;;  %v211_v39 = vld [vmem:[%s701_s5 + $0x20] sm:$0xff]  ;;  %v212_v40 = vld [vmem:[%s701_s5 + $0x28] sm:$0xff] }
   0xa   :  { %458 = vmatprep.subr.bf16.mxu1 %v511_v0  ;;  %v480_v38 = vpack.c.bf16 %v210_v37, %v209_v35  ;;  %v483_v41 = vpack.c.bf16 %v212_v40, %v211_v39  ;;  %v213_v42 = vld [vmem:[%s701_s5 + $0x30] sm:$0xff]  ;;  %v214_v43 = vld [vmem:[%s701_s5 + $0x38] sm:$0xff]  ;;  %v215_v45 = vld [vmem:[%s701_s5 + $0x40] sm:$0xff] }
   0xb   :  { %374 = vmatmul.mubr.msk.f32.vlgmr.msra.gmra.mrb[0].mxu0 %vm38_vm1, %v26_v16  ;;  %v486_v44 = vpack.c.bf16 %v214_v43, %v213_v42  ;;  %v216_v46 = vld [vmem:[%s701_s5 + $0x48] sm:$0xff]  ;;  %v322_v48 = vld [vmem:[%s702_s2] ss:$0 sm:$0xff]  ;;  %v217_v53 = vld [vmem:[%s701_s5 + $0x50] sm:$0xff] }
   0xc   :  { %443 = vmatprep.mubr.msk.f32.mxu0 %vm512_vm0, %v513_v4  ;;  %478 = vmatpush3.bf16.msra.mxu0 %v477_v36  ;;  %v489_v47 = vpack.c.bf16 %v216_v46, %v215_v45  ;;  %v218_v54 = vld [vmem:[%s701_s5 + $0x58] sm:$0xff]  ;;  %v219_v56 = vld [vmem:[%s701_s5 + $0x60] sm:$0xff]  ;;  %v220_v57 = vld [vmem:[%s701_s5 + $0x68] sm:$0xff] }
   0xd   :  { %460 = vmatpush3.bf16.msra.mxu1 %v459_v17  ;;  %479 = vmatprep.subr.bf16.mxu0 %v511_v0  ;;  %v492_v55 = vpack.c.bf16 %v218_v54, %v217_v53  ;;  %v495_v58 = vpack.c.bf16 %v220_v57, %v219_v56  ;;  %v221_v59 = vld [vmem:[%s701_s5 + $0x70] sm:$0xff]  ;;  %v222_v60 = vld [vmem:[%s701_s5 + $0x78] sm:$0xff]  ;;  %v324_v62 = vld [vmem:[%s703_s4] ss:$0 sm:$0xff] }
   0xe   :  { %461 = vmatprep.subr.bf16.mxu1 %v511_v0  ;;  %v498_v61 = vpack.c.bf16 %v222_v60, %v221_v59  ;;  %v325_v4 = vld [vmem:[%s704_s6] ss:$0 sm:$0xff] }
  0x10   :  { %481 = vmatpush3.bf16.msra.mxu0 %v480_v38 }
  0x11   :  { %463 = vmatpush3.bf16.msra.mxu1 %v462_v20  ;;  %482 = vmatprep.subr.bf16.mxu0 %v511_v0 }
  0x12   :  { %464 = vmatprep.subr.bf16.mxu1 %v511_v0 }
  0x14   :  { %484 = vmatpush3.bf16.msra.mxu0 %v483_v41 }
  0x15   :  { %466 = vmatpush3.bf16.msra.mxu1 %v465_v23  ;;  %485 = vmatprep.subr.bf16.mxu0 %v511_v0 }
  0x16   :  { %467 = vmatprep.subr.bf16.mxu1 %v511_v0 }
  0x18   :  { %487 = vmatpush3.bf16.msra.mxu0 %v486_v44 }
  0x19   :  { %469 = vmatpush3.bf16.msra.mxu1 %v468_v26  ;;  %488 = vmatprep.subr.bf16.mxu0 %v511_v0 }
  0x1a   :  { %470 = vmatprep.subr.bf16.mxu1 %v511_v0 }
  0x1c   :  { %490 = vmatpush3.bf16.msra.mxu0 %v489_v47 }
  0x1d   :  { %472 = vmatpush3.bf16.msra.mxu1 %v471_v29  ;;  %491 = vmatprep.subr.bf16.mxu0 %v511_v0 }
  0x1e   :  { %473 = vmatprep.subr.bf16.mxu1 %v511_v0 }
  0x20   :  { %493 = vmatpush3.bf16.msra.mxu0 %v492_v55 }
  0x21   :  { %475 = vmatpush3.bf16.msra.mxu1 %v474_v32  ;;  %494 = vmatprep.subr.bf16.mxu0 %v511_v0 }
  0x24   :  { %496 = vmatpush3.bf16.msra.mxu0 %v495_v58 }
  0x25   :  { %497 = vmatprep.subr.bf16.mxu0 %v511_v0 }
  0x28   :  { %499 = vmatpush3.bf16.msra.mxu0 %v498_v61 }
  0xde   :  { %v108_v49 = vpop.f32.mrb[0].mxu0 }
  0xdf   :  { %v109_v50 = vadd.f32 %v322_v48, %v108_v49  ;;  %v375_v51 = vpop.f32.mrb[1].mxu0 }
  0xe1   :  { %503 = vtanh.f32 %v109_v50 }
  0xeb   :  { %v504_v52 = vpop.eup %503 }
  0xec   :  { %409 = vmatmul.mubr.f32.vlgmr.msra.gmra.mrb[0].mxu1 %v504_v52 }
 0x1bf   :  { %v202_v63 = vpop.f32.mrb[0].mxu1 }
 0x1c0   :  { %v203_v1 = vadd.f32 %v324_v62, %v202_v63  ;;  %v410_v2 = vpop.f32.mrb[1].mxu1 }
 0x1c2   :  { %505 = vtanh.f32 %v203_v1 }
 0x1cc   :  { %v506_v3 = vpop.eup %505 }
 0x1cd   :  { %444 = vmatmul.mubr.f32.vlgmr.msra.gmra.mrb[2].mxu0 %v506_v3 }
 0x2a0   :  { %v296_v5 = vpop.f32.mrb[2].mxu0 }
 0x2a1   :  { %v297_v6 = vadd.f32 %v325_v4, %v296_v5  ;;  %v445_v7 = vpop.f32.mrb[3].mxu0 }
 0x2a3   :  { %v301_v8 = vand.u32 2147483647, %v297_v6  ;;  %v300_v18 = vmax.f32 %v297_v6, 0.0 }
 0x2a5   :  { %v302_v0 = vsub.f32 0.0, %v301_v8 }
 0x2a7   :  { %v303_v9 = vmul.f32 1.442695, %v302_v0 }
 0x2a9   :  { %507 = vpow2.f32 %v303_v9 }
 0x2b3   :  { %v508_v10 = vpop.eup %507 }
 0x2b4   :  { %v305_v11 = vadd.f32 1.0, %v508_v10  ;;  %v308_v12 = vmul.f32 -0.5, %v508_v10  ;;  %v311_v14 = vand.u32 2147483647, %v508_v10 }
 0x2b6   :  { %509 = vlog2.f32 %v305_v11  ;;  %v309_v13 = vadd.f32 1.0, %v308_v12  ;;  %vm312_vm2 = vcmp.lt.f32.partialorder %v311_v14, 0.0004427343 }
 0x2b8   :  { %v310_v17 = vmul.f32 %v508_v10, %v309_v13 }
 0x2c0   :  { %v510_v15 = vpop.eup %509 }
 0x2c1   :  { %v307_v16 = vmul.f32 0.6931472, %v510_v15 }
 0x2c3   :  { %v313_v19 = vsel %vm312_vm2, %v310_v17, %v307_v16 }
 0x2c4   :  { %v314_v20 = vadd.f32 %v313_v19, %v300_v18 }
 0x2c6   :  { %v315_v21 = vadd.f32 1.0, %v314_v20 }
 0x2c8   :  { %317 = vst.msk [vmem:[%s705_s7] sm:$0xff] %vm316_vm3, %v315_v21 }

</bundles_post_ra>
